<compile_context>
chip_gen: v7x
topology: tpu7x:2x2x1
jax: 0.10.0
libtpu: 0.0.40
codegen_flags: <defaults>
</compile_context>

<pallas_src>
import functools

import jax
import jax.numpy as jnp
from jax import lax
from jax.experimental import pallas as pl
from jax.experimental.pallas import tpu as pltpu

_INV_SQRT2 = 0.7071067811865476
_SQRT_2_OVER_PI = 0.7978845608028654
_MiB = 1024 * 1024
_TM_CANDIDATES = (1024, 768, 512, 384, 256, 128, 64, 32, 16, 8)


def _query_vmem_capacity_bytes():
    # Generation-aware budget: 128 MiB on v5e/v6e, 64 MiB per TC on v7x.
    try:
        cap = int(pltpu.get_tpu_info().vmem_capacity_bytes)
        if cap > 0:
            return cap
    except Exception:
        pass
    return 64 * _MiB  # conservative fallback (v7x per-core)


_VMEM_CAPACITY = _query_vmem_capacity_bytes()
_TILE_BUDGET = int(_VMEM_CAPACITY * 0.70)  # headroom for Mosaic internal scratch


# --------------------------------------------------------------------------- #
# Kernels
# --------------------------------------------------------------------------- #
def _gelu_f32(h, approximate):
    if approximate:
        # tanh form -> routes through the EUP (separate VLIW slot).
        c = jnp.float32(_SQRT_2_OVER_PI)
        return 0.5 * h * (1.0 + jnp.tanh(c * (h + jnp.float32(0.044715) * h * h * h)))
    # Exact (erf) GELU -- matches torch.nn.GELU() default.
    return 0.5 * h * (1.0 + lax.erf(h * jnp.float32(_INV_SQRT2)))


def _ffn_kernel_single(x_ref, w1_ref, b1_ref, w2_ref, b2_ref, o_ref, *,
                       approximate_gelu):
    # Whole hidden extent in one step: no f32 accumulator round-trip needed.
    h = jnp.dot(x_ref[...], w1_ref[...], preferred_element_type=jnp.float32)
    h = h + b1_ref[...].astype(jnp.float32)
    h = _gelu_f32(h, approximate_gelu)
    out = jnp.dot(h.astype(w2_ref.dtype), w2_ref[...],
                  preferred_element_type=jnp.float32)
    o_ref[...] = (out + b2_ref[...].astype(jnp.float32)).astype(o_ref.dtype)


def _ffn_kernel_acc(x_ref, w1_ref, b1_ref, w2_ref, b2_ref, o_ref, acc_ref, *,
                    approximate_gelu):
    # Grid: (row_blocks, hidden_blocks); axis 1 is the reduction.
    k = pl.program_id(1)

    @pl.when(k == 0)
    def _init():
        acc_ref[...] = jnp.zeros_like(acc_ref)

    h = jnp.dot(x_ref[...], w1_ref[...], preferred_element_type=jnp.float32)
    h = h + b1_ref[...].astype(jnp.float32)
    h = _gelu_f32(h, approximate_gelu)
    acc_ref[...] += jnp.dot(h.astype(w2_ref.dtype), w2_ref[...],
                            preferred_element_type=jnp.float32)

    @pl.when(k == pl.num_programs(1) - 1)
    def _finalize():
        o_ref[...] = (acc_ref[...] + b2_ref[...].astype(jnp.float32)
                      ).astype(o_ref.dtype)


# --------------------------------------------------------------------------- #
# VMEM-aware tile selection
# --------------------------------------------------------------------------- #
def _round_up(x, m):
    return ((x + m - 1) // m) * m


def _footprint_bytes(tm, th, dim, hidden, isz, osz, b_isz, io_mult):
    n_k = max(hidden // th, 1)
    fb = io_mult * tm * dim * isz          # x tile(s)
    fb += io_mult * tm * dim * osz         # output tile(s)
    fb += 2 * dim * th * isz               # W1 slice (double buffered)
    fb += 2 * th * dim * isz               # W2 slice (double buffered)
    fb += 2 * (th + dim) * b_isz           # bias slices
    fb += tm * th * 4                      # f32 hidden intermediate
    if n_k > 1:
        fb += tm * dim * 4                 # f32 accumulator scratch
    return fb


def _choose_tiles(n_rows, dim, hidden, isz, osz, b_isz, block_m, block_h):
    # Row-tile candidates, largest first: AI of the weight stream ~ TM
    # flop/byte, so TM is the primary lever (review: push toward 768-1024).
    rows8 = _round_up(max(n_rows, 1), 8)
    if n_rows <= 8:
        tm_cands = [max(n_rows, 1)]
    elif block_m is not None:
        tm_cands = [min(_round_up(block_m, 8), rows8)]
    else:
        tm_cands, seen = [], set()
        for t in _TM_CANDIDATES:
            t = min(t, rows8)
            if t not in seen:
                seen.add(t)
                tm_cands.append(t)

    # Hidden-tile candidates: multiples of 128 that divide `hidden` (lane
    # constraint on the W1/W2 blocks), or the full extent.
    if block_h is not None:
        th_cands = [block_h]
    elif hidden % 128 != 0 or hidden <= 128:
        th_cands = [hidden]
    else:
        th_cands = [hidden] + [d for d in range(hidden - 128, 127, -128)
                               if hidden % d == 0]

    def best(io_mult):
        for tm in tm_cands:
            for th in th_cands:
                if _footprint_bytes(tm, th, dim, hidden, isz, osz, b_isz,
                                    io_mult) <= _TILE_BUDGET:
                    return tm, th
        return None

    choice = best(io_mult=2)
    single_io = False
    alt = best(io_mult=1)
    if (alt is not None and hidden // alt[1] > 1
            and (choice is None or alt[0] > choice[0])):
        # Single-buffering the k-invariant x/out blocks buys a larger TM.
        choice, single_io = alt, True
    if choice is None:  # nothing fits the budget; fall back to smallest tiles
        choice = (tm_cands[-1], th_cands[-1])

    tm, th = choice
    # v7x has two TensorCores: ensure the "parallel" row axis has >= 2 blocks
    # so both cores get work for short sequences.
    if block_m is None and n_rows >= 16 and pl.cdiv(n_rows, tm) == 1:
        tm = max(8, _round_up((n_rows + 1) // 2, 8))
    return tm, th, single_io


# --------------------------------------------------------------------------- #
# Wrapper
# --------------------------------------------------------------------------- #
@functools.partial(
    jax.jit,
    static_argnames=("block_m", "block_h", "compute_dtype", "approximate_gelu"))
def feed_forward(x, w1, b1, w2, b2, *, block_m=None, block_h=None,
                 compute_dtype=None, approximate_gelu=False):
    """x: (..., dim). w1: (dim, hidden), b1: (hidden,), w2: (hidden, dim),
    b2: (dim,). Returns same shape/dtype as x.

    PERFORMANCE NOTE: pass compute_dtype=jnp.bfloat16 for the fast MXU path
    (full 197/918/996 TF/s and half the W1/W2 HBM bytes; accumulation stays
    f32, results match an f32 reference to ~1e-2).  The default (None) keeps
    exact f32 numerics for f32 inputs, matching the torch module, at a 4-8x
    matmul-throughput cost on the f32 path.
    """
    orig_shape = x.shape
    dim = orig_shape[-1]
    hidden = w1.shape[1]

    if compute_dtype is None:
        compute_dtype = jnp.promote_types(x.dtype, w1.dtype)
    compute_dtype = jnp.dtype(compute_dtype)

    # Cast once in the wrapper, not per-tile inside the kernel.
    x2 = x.reshape(-1, dim).astype(compute_dtype)
    w1c = w1.astype(compute_dtype)
    w2c = w2.astype(compute_dtype)
    b1_2d = b1.reshape(1, hidden)
    b2_2d = b2.reshape(1, dim)

    n_rows = x2.shape[0]
    isz = compute_dtype.itemsize
    osz = jnp.dtype(x.dtype).itemsize
    b_isz = jnp.dtype(b1.dtype).itemsize

    tm, th, single_io = _choose_tiles(n_rows, dim, hidden, isz, osz, b_isz,
                                      block_m, block_h)
    assert hidden % th == 0, "hidden tile must divide hidden (reduction axis)"
    n_k = hidden // th
    n_row_blocks = pl.cdiv(n_rows, tm)
    grid = (n_row_blocks, n_k)

    footprint = _footprint_bytes(tm, th, dim, hidden, isz, osz, b_isz,
                                 1 if single_io else 2)
    # Clamp the scoped VMEM request to the real device capacity (64 MiB v7x).
    vmem_limit = int(min(_VMEM_CAPACITY,
                         max(32 * _MiB, int(1.3 * footprint) + 2 * _MiB)))

    # Advisory cost estimate so XLA schedules surrounding ops around the call.
    cost = pl.CostEstimate(
        flops=4 * n_rows * hidden * dim,
        transcendentals=n_rows * hidden,
        bytes_accessed=(n_rows * dim * (isz + osz)
                        + n_row_blocks * 2 * dim * hidden * isz
                        + (hidden + dim) * b_isz))

    if single_io:
        # x / output block indices are invariant along k: single-buffer them
        # to reclaim VMEM for a larger TM (one un-overlapped DMA per row
        # block, amortized over the n_k reduction steps).
        x_spec = pl.BlockSpec((tm, dim), lambda i, k: (i, 0),
                              pipeline_mode=pl.Buffered(1))
        o_spec = pl.BlockSpec((tm, dim), lambda i, k: (i, 0),
                              pipeline_mode=pl.Buffered(1))
    else:
        x_spec = pl.BlockSpec((tm, dim), lambda i, k: (i, 0))
        o_spec = pl.BlockSpec((tm, dim), lambda i, k: (i, 0))

    in_specs = [
        x_spec,                                         # x rows
        pl.BlockSpec((dim, th), lambda i, k: (0, k)),   # W1 hidden slice
        pl.BlockSpec((1, th), lambda i, k: (0, k)),     # b1 slice
        pl.BlockSpec((th, dim), lambda i, k: (k, 0)),   # W2 hidden slice
        pl.BlockSpec((1, dim), lambda i, k: (0, 0)),    # b2
    ]

    if n_k == 1:
        kernel = functools.partial(_ffn_kernel_single,
                                   approximate_gelu=approximate_gelu)
        scratch_shapes = []
    else:
        kernel = functools.partial(_ffn_kernel_acc,
                                   approximate_gelu=approximate_gelu)
        scratch_shapes = [pltpu.VMEM((tm, dim), jnp.float32)]

    out = pl.pallas_call(
        kernel,
        out_shape=jax.ShapeDtypeStruct((n_rows, dim), x.dtype),
        grid_spec=pltpu.PrefetchScalarGridSpec(
            num_scalar_prefetch=0,
            grid=grid,
            in_specs=in_specs,
            out_specs=o_spec,
            scratch_shapes=scratch_shapes,
        ),
        compiler_params=pltpu.CompilerParams(
            dimension_semantics=("parallel", "arbitrary"),
            vmem_limit_bytes=vmem_limit,
        ),
        cost_estimate=cost,
    )(x2, w1c, b1_2d, w2c, b2_2d)

    return out.reshape(orig_shape)


def feed_forward_ref(x, w1, b1, w2, b2, approximate_gelu=False):
    h = jnp.dot(x, w1) + b1
    h = jax.nn.gelu(h, approximate=approximate_gelu)
    return jnp.dot(h, w2) + b2


def _make_params(key, dim, hidden):
    k_x, k_w1, k_b1, k_w2, k_b2 = jax.random.split(key, 5)
    lim1 = 1.0 / float(jnp.sqrt(dim))
    lim2 = 1.0 / float(jnp.sqrt(hidden))
    w1 = jax.random.uniform(k_w1, (dim, hidden), minval=-lim1, maxval=lim1,
                            dtype=jnp.float32)
    b1 = jax.random.uniform(k_b1, (hidden,), minval=-lim1, maxval=lim1,
                            dtype=jnp.float32)
    w2 = jax.random.uniform(k_w2, (hidden, dim), minval=-lim2, maxval=lim2,
                            dtype=jnp.float32)
    b2 = jax.random.uniform(k_b2, (dim,), minval=-lim2, maxval=lim2,
                            dtype=jnp.float32)
    return k_x, w1, b1, w2, b2


if __name__ == "__main__":
    key = jax.random.PRNGKey(0)
    key1, key2, key3, key4 = jax.random.split(key, 4)

    # Case 1: small shapes, single-k fast path (no accumulator scratch),
    #         exact f32 numerics, 2 row blocks (v7x dual-TC rule).
    batch, seq, dim, hidden = 2, 8, 32, 64
    k_x, w1, b1, w2, b2 = _make_params(key1, dim, hidden)
    x = jax.random.normal(k_x, (batch, seq, dim), dtype=jnp.float32)
    out = jax.block_until_ready(feed_forward(x, w1, b1, w2, b2))
    ref = feed_forward_ref(x, w1, b1, w2, b2)
    assert out.shape == x.shape and out.dtype == x.dtype
    assert jnp.allclose(out, ref, atol=1e-5, rtol=1e-5), (
        float(jnp.max(jnp.abs(out - ref))))

    # Case 2: non-divisible row count (masked tail store) + multi-step hidden
    #         reduction through the f32 accumulator scratch.
    batch, seq, dim, hidden = 3, 5, 128, 256
    k_x, w1, b1, w2, b2 = _make_params(key2, dim, hidden)
    x = jax.random.normal(k_x, (batch, seq, dim), dtype=jnp.float32)
    out = jax.block_until_ready(
        feed_forward(x, w1, b1, w2, b2, block_m=8, block_h=128))
    ref = feed_forward_ref(x, w1, b1, w2, b2)
    assert out.shape == x.shape and out.dtype == x.dtype
    assert jnp.allclose(out, ref, atol=1e-4, rtol=1e-5), (
        float(jnp.max(jnp.abs(out - ref))))

    # Case 3: bf16 MXU compute path (mixed precision; f32 accumulation).
    batch, seq, dim, hidden = 2, 64, 256, 512
    k_x, w1, b1, w2, b2 = _make_params(key3, dim, hidden)
    x = jax.random.normal(k_x, (batch, seq, dim), dtype=jnp.float32)
    out = jax.block_until_ready(
        feed_forward(x, w1, b1, w2, b2, compute_dtype=jnp.bfloat16))
    ref = feed_forward_ref(x, w1, b1, w2, b2)
    assert out.shape == x.shape and out.dtype == x.dtype
    assert jnp.allclose(out, ref, atol=5e-2, rtol=5e-2), (
        float(jnp.max(jnp.abs(out - ref))))

    # Case 4: approximate (tanh/EUP) GELU option.
    batch, seq, dim, hidden = 1, 16, 64, 128
    k_x, w1, b1, w2, b2 = _make_params(key4, dim, hidden)
    x = jax.random.normal(k_x, (batch, seq, dim), dtype=jnp.float32)
    out = jax.block_until_ready(
        feed_forward(x, w1, b1, w2, b2, approximate_gelu=True))
    ref = feed_forward_ref(x, w1, b1, w2, b2, approximate_gelu=True)
    assert out.shape == x.shape and out.dtype == x.dtype
    assert jnp.allclose(out, ref, atol=1e-4, rtol=1e-5), (
        float(jnp.max(jnp.abs(out - ref))))

    print("KERNEL_OK")
</pallas_src>

<mosaic_0001>
module attributes {stable_mosaic.version = 11 : i64} {
  func.func @_ffn_kernel_single(%arg0: i32, %arg1: i32, %arg2: memref<8x32xf32, #tpu.memory_space<vmem>>, %arg3: memref<32x64xf32, #tpu.memory_space<vmem>>, %arg4: memref<1x64xf32, #tpu.memory_space<vmem>>, %arg5: memref<64x32xf32, #tpu.memory_space<vmem>>, %arg6: memref<1x32xf32, #tpu.memory_space<vmem>>, %arg7: memref<8x32xf32, #tpu.memory_space<vmem>>) attributes {dimension_semantics = [#tpu.dimension_semantics<parallel>, #tpu.dimension_semantics<arbitrary>], iteration_bounds = array<i64: 2, 1>, scalar_prefetch = 0 : i64, scratch_operands = 0 : i64, tpu.core_type = #tpu.core_type<tc>, window_params = [{transform_indices = @transform_0, window_bounds = array<i64: 8, 32>}, {transform_indices = @transform_1, window_bounds = array<i64: 32, 64>}, {transform_indices = @transform_2, window_bounds = array<i64: 1, 64>}, {transform_indices = @transform_3, window_bounds = array<i64: 64, 32>}, {pipeline_mode = #tpu.pipeline_mode<synchronous>, transform_indices = @transform_4, window_bounds = array<i64: 1, 32>}, {transform_indices = @transform_5, window_bounds = array<i64: 8, 32>}]} {
    %c0 = arith.constant 0 : index
    %c0_0 = arith.constant 0 : index
    %0 = vector.load %arg2[%c0, %c0_0] : memref<8x32xf32, #tpu.memory_space<vmem>>, vector<8x32xf32>
    %c0_1 = arith.constant 0 : index
    %c0_2 = arith.constant 0 : index
    %1 = vector.load %arg3[%c0_1, %c0_2] : memref<32x64xf32, #tpu.memory_space<vmem>>, vector<32x64xf32>
    %cst = arith.constant dense<0.000000e+00> : vector<8x64xf32>
    %2 = tpu.matmul %0, %1, %cst {dimension_numbers = #tpu.dot_dimension_numbers<[1], [0], [0], [1], [0, 0, 1, 1], [], []>} : vector<8x32xf32>, vector<32x64xf32>, vector<8x64xf32> -> vector<8x64xf32>
    %c0_3 = arith.constant 0 : index
    %c0_4 = arith.constant 0 : index
    %3 = vector.load %arg4[%c0_3, %c0_4] : memref<1x64xf32, #tpu.memory_space<vmem>>, vector<1x64xf32>
    %4 = vector.broadcast %3 : vector<1x64xf32> to vector<8x64xf32>
    %5 = arith.addf %2, %4 : vector<8x64xf32>
    %cst_5 = arith.constant 5.000000e-01 : f32
    %6 = vector.broadcast %cst_5 : f32 to vector<8x64xf32>
    %7 = arith.mulf %6, %5 : vector<8x64xf32>
    %cst_6 = arith.constant 0.707106769 : f32
    %8 = vector.broadcast %cst_6 : f32 to vector<8x64xf32>
    %9 = arith.mulf %5, %8 : vector<8x64xf32>
    %10 = math.erf %9 : vector<8x64xf32>
    %cst_7 = arith.constant 1.000000e+00 : f32
    %11 = vector.broadcast %cst_7 : f32 to vector<8x64xf32>
    %12 = arith.addf %11, %10 : vector<8x64xf32>
    %13 = arith.mulf %7, %12 : vector<8x64xf32>
    %c0_8 = arith.constant 0 : index
    %c0_9 = arith.constant 0 : index
    %14 = vector.load %arg5[%c0_8, %c0_9] : memref<64x32xf32, #tpu.memory_space<vmem>>, vector<64x32xf32>
    %cst_10 = arith.constant dense<0.000000e+00> : vector<8x32xf32>
    %15 = tpu.matmul %13, %14, %cst_10 {dimension_numbers = #tpu.dot_dimension_numbers<[1], [0], [0], [1], [0, 0, 1, 1], [], []>} : vector<8x64xf32>, vector<64x32xf32>, vector<8x32xf32> -> vector<8x32xf32>
    %c0_11 = arith.constant 0 : index
    %c0_12 = arith.constant 0 : index
    %16 = vector.load %arg6[%c0_11, %c0_12] : memref<1x32xf32, #tpu.memory_space<vmem>>, vector<1x32xf32>
    %17 = vector.broadcast %16 : vector<1x32xf32> to vector<8x32xf32>
    %18 = arith.addf %15, %17 : vector<8x32xf32>
    %c0_13 = arith.constant 0 : index
    %c0_14 = arith.constant 0 : index
    %19 = vector.load %arg7[%c0_13, %c0_14] : memref<8x32xf32, #tpu.memory_space<vmem>>, vector<8x32xf32>
    tpu.vector_store %arg7[%c0_13, %c0_14], %18 {strides = array<i32>} : memref<8x32xf32, #tpu.memory_space<vmem>>, vector<8x32xf32>,
    return
  }
  func.func @transform_0(%arg0: i32, %arg1: i32) -> (i32, i32) {
    %c0_i32 = arith.constant 0 : i32
    %c0_i32_0 = arith.constant 0 : i32
    return %arg0, %c0_i32 : i32, i32
  }
  func.func @transform_1(%arg0: i32, %arg1: i32) -> (i32, i32) {
    %c0_i32 = arith.constant 0 : i32
    %c0_i32_0 = arith.constant 0 : i32
    return %c0_i32, %arg1 : i32, i32
  }
  func.func @transform_2(%arg0: i32, %arg1: i32) -> (i32, i32) {
    %c0_i32 = arith.constant 0 : i32
    %c0_i32_0 = arith.constant 0 : i32
    return %c0_i32, %arg1 : i32, i32
  }
  func.func @transform_3(%arg0: i32, %arg1: i32) -> (i32, i32) {
    %c0_i32 = arith.constant 0 : i32
    %c0_i32_0 = arith.constant 0 : i32
    return %arg1, %c0_i32 : i32, i32
  }
  func.func @transform_4(%arg0: i32, %arg1: i32) -> (i32, i32) {
    %c0_i32 = arith.constant 0 : i32
    %c0_i32_0 = arith.constant 0 : i32
    %c0_i32_1 = arith.constant 0 : i32
    return %c0_i32, %c0_i32_0 : i32, i32
  }
  func.func @transform_5(%arg0: i32, %arg1: i32) -> (i32, i32) {
    %c0_i32 = arith.constant 0 : i32
    %c0_i32_0 = arith.constant 0 : i32
    return %arg0, %c0_i32 : i32, i32
  }
}

</mosaic_0001>

<bundles_post_ra>
// kernel: feed_forward.1
= control target key start
LH: loop header
LB: loop body
LE: loop exit
PB: predicated region body
PF: predicated region fallthrough
CT: control target
= control target key end

     0   :  { %10 = vsyncpa [#allocation3], 0  ;;  %s999_s0 = inlined_call_operand.vmem [shape: f32[16,32], index: 0, kind: input, shape index: {}]   ;;  %s1000_s1 = inlined_call_operand.vmem [shape: f32[32,64], index: 1, kind: input, shape index: {}]   ;;  %s1001_s2 = inlined_call_operand.vmem [shape: f32[1,64], index: 2, kind: input, shape index: {}]   ;;  %s1002_s3 = inlined_call_operand.vmem [shape: f32[64,32], index: 3, kind: input, shape index: {}]   ;;  %s1003_s4 = inlined_call_operand.vmem [shape: f32[1,32], index: 4, kind: input, shape index: {}]   ;;  %s1004_s5 = inlined_call_operand.hbm [shape: f32[16,32], index: 5, kind: output, shape index: {}]  }
   0x1   :  { %12 = vsyncpa [#allocation3 + $0x1], 0  ;;  %s843_s18 = smov 0   ;;  %s845_s19 = smov 0  }
   0x2   :  { %s847_s20 = smov 0   ;;  %s849_s21 = smov 0  }
   0x3   :  { %s851_s22 = smov 0   ;;  %s853_s23 = smov 0  }
   0x4 LB: > { %s589_s24 = sadd.s32 4294967295, %s807_s23   ;;  %s590_s25 = sadd.s32 4294967294, %s807_s23   ;;  %s807_s23 = sphi %s853_s23, %s18_s23   ;;  %s803_s22 = sphi %s851_s22, %s1011_s22   ;;  %s799_s21 = sphi %s849_s21, %s1010_s21   ;;  %s795_s20 = sphi %s847_s20, %s1009_s20   ;;  %s791_s19 = sphi %s845_s19, %s1008_s19   ;;  %s787_s18 = sphi %s843_s18, %s1007_s18  }
   0x5   : > { %s30_s26 = sadd.s32 1, %s803_s22  ;;  %s162_s27 = sadd.s32 1, %s795_s20 }
   0x6   : > { %p32_p0 = scmp.ge.s32.totalorder %s30_s26, 2  ;;  %p172_p1 = scmp.ne.s32.totalorder %s795_s20, %s791_s19 }
   0x7   : > { %p173_p2 = scmp.eq.s32.totalorder %s589_s24, 1  ;;  %p178_p3 = scmp.ne.s32.totalorder %s791_s19, %s787_s18 }
   0x8   : > { %s1013_s26 = smov (%p32_p0, %s30_s26), 0  ;;  %p179_p5 = scmp.eq.s32.totalorder %s590_s25, 1 }
   0x9   : > { %p883_p4 = por %p173_p2, %p172_p1  ;;  %s159_s29 = ssub.s32 %s803_s22, %s1013_s26 }
   0xa   : > { %p596_p6 = scmp.ge.s32.totalorder %s807_s23, 1  ;;  %p160_p7 = scmp.eq.s32.totalorder %s159_s29, 0 }
   0xb   : > { %p890_p8 = por %p179_p5, %p178_p3  ;;  %p229_p9 = scmp.lt.s32.totalorder %s807_s23, 3 }
   0xc   : > { %s896_s6 = scalar_select %p160_p7, %s795_s20, %s162_s27  }
   0xd   : > { %p230_p10 = pnand %p596_p6, %p229_p9 }
   0xe   : > { %v286_v0 = vld [vmem:[%s1000_s1] sm:$0xff] (!%p230_p10)  ;;  %v287_v1 = vld [vmem:[%s1000_s1 + $0x8] sm:$0xff] (!%p230_p10)  ;;  %v288_v2 = vld [vmem:[%s1000_s1 + $0x10] sm:$0xff] (!%p230_p10)  ;;  %v809_v3 = vmov (!%p230_p10), 0.0|0.0   ;;  %vm810_vm0 = vmmov (!%p230_p10), 0   ;;  %v811_v6 = vmov (!%p230_p10), 0.0  }
   0xf   : > { %233 = sbr.rel (%p230_p10) target bundleno = 486 (0x1e6), region = 40  ;;  %651 = vmatprep.subr.bf16.mxu0 (!%p230_p10), %v809_v3  ;;  %v652_v4 = vpack.c.bf16 (!%p230_p10), %v287_v1, %v286_v0  ;;  %v289_v5 = vld [vmem:[%s1000_s1 + $0x18] sm:$0xff] (!%p230_p10)  ;;  %629 = vmatprep.mubr.msk.f32.mxu0 (!%p230_p10), %vm810_vm0, %v811_v6  ;;  %p268_p11 = scmp.lt.s32.totalorder (!%p230_p10), %s799_s21, 1  ;;  %vm297_vm1 = vcmask (!%p230_p10), 261120   ;;  %v376_v9 = vld [vmem:[%s1002_s3] sm:$0xff] (!%p230_p10)  ;;  %v377_v10 = vld [vmem:[%s1002_s3 + $0x8] sm:$0xff] (!%p230_p10) }
  0x10   : > { %657 = vmatprep.subr.bf16.mxu1 (!%p230_p10), %v809_v3  ;;  %648 = vmatprep.mubr.msk.f32.mxu1 (!%p230_p10), %vm810_vm0, %v811_v6  ;;  %v655_v7 = vpack.c.bf16 (!%p230_p10), %v289_v5, %v288_v2  ;;  %v658_v11 = vpack.c.bf16 (!%p230_p10), %v377_v10, %v376_v9  ;;  %v378_v12 = vld [vmem:[%s1002_s3 + $0x10] sm:$0xff] (!%p230_p10)  ;;  %v379_v13 = vld [vmem:[%s1002_s3 + $0x18] sm:$0xff] (!%p230_p10)  ;;  %v380_v15 = vld [vmem:[%s1002_s3 + $0x20] sm:$0xff] (!%p230_p10)  ;;  %vm391_vm2 = vcmask (!%p230_p10), 523264   ;;  %s265_s8 = sand.u32 (!%p230_p10), 1, %s791_s19   ;;  %s604_s12 = sshll.u32 (!%p230_p10), %s799_s21, 7 }
  0x11   : > { %653 = vmatpush3.bf16.msra.mxu0 (!%p230_p10), %v652_v4  ;;  %v661_v14 = vpack.c.bf16 (!%p230_p10), %v379_v13, %v378_v12  ;;  %v381_v16 = vld [vmem:[%s1002_s3 + $0x28] sm:$0xff] (!%p230_p10)  ;;  %v382_v18 = vld [vmem:[%s1002_s3 + $0x30] sm:$0xff] (!%p230_p10)  ;;  %v383_v19 = vld [vmem:[%s1002_s3 + $0x38] sm:$0xff] (!%p230_p10)  ;;  %s597_s9 = sshll.u32 (!%p230_p10), %s265_s8, 3  ;;  %s951_s17 = scalar_lea.hbm (!%p230_p10), %s1004_s5, %s604_s12 }
  0x12   : > { %654 = vmatprep.subr.bf16.mxu0 (!%p230_p10), %v809_v3  ;;  %659 = vmatpush3.bf16.msra.mxu1 (!%p230_p10), %v658_v11  ;;  %v664_v17 = vpack.c.bf16 (!%p230_p10), %v381_v16, %v380_v15  ;;  %v667_v20 = vpack.c.bf16 (!%p230_p10), %v383_v19, %v382_v18  ;;  %v599_v21 = vld [vmem:[%s1001_s2] ss:$0 sm:$0xff] (!%p230_p10)  ;;  %s267_s13 = scalar_lea.vmem (!%p230_p10), [#allocation2], %s597_s9  ;;  %s467_s24 = scalar_lea.sflag (!%p230_p10), [#allocation3], %s265_s8 }
  0x13   : > { %660 = vmatprep.subr.bf16.mxu1 (!%p230_p10), %v809_v3  ;;  %v601_v30 = vld [vmem:[%s1003_s4] ss:$0 sm:$0xff] (!%p230_p10)  ;;  %s480_s14 = sshll.u32 (!%p230_p10), %s267_s13, 4  ;;  %s953_s14 = int_to_ptr.vmem [resolvable:$true] %s480_s14 }
  0x15   : > { %656 = vmatpush3.bf16.msra.mxu0 (!%p230_p10), %v655_v7 }
  0x16   : > { %s269_s15 = scalar_select %p268_p11, %s799_s21, 1  ;;  %662 = vmatpush3.bf16.msra.mxu1 %v661_v14 }
  0x17   : > { %663 = vmatprep.subr.bf16.mxu1 %v809_v3  ;;  %s812_s21 = smov [#allocation2]  }
  0x18   : > { %s598_s16 = sshll.u32 %s269_s15, 3  ;;  %s733_s27 = sshll.u32 %s812_s21, 4  ;;  %s734_s27 = int_to_ptr.vmem [resolvable:$false] %s733_s27 }
  0x19   : > { %s271_s25 = scalar_lea.vmem %s999_s0, %s598_s16  ;;  %s735_s29 = scalar_lea.vmem %s734_s27, 256 }
  0x1a   : > { %v285_v8 = vld [vmem:[%s271_s25] sm:$0xff]  ;;  %665 = vmatpush3.bf16.msra.mxu1 %v664_v17  ;;  %s729_s25 = scalar_lea.vmem %s953_s14, 128  ;;  %p736_p1 = scmp.lt.s32.totalorder %s953_s14, %s734_s27 }
  0x1b   : > { %630 = vmatmul.mubr.msk.f32.vlgmr.msra.gmra.mrb[0].mxu0 %vm297_vm1, %v285_v8  ;;  %666 = vmatprep.subr.bf16.mxu1 %v809_v3  ;;  %p730_p12 = scmp.ne.s32.totalorder %s953_s14, %s729_s25  ;;  %p737_p2 = scmp.lt.s32.totalorder %s735_s29, %s729_s25 }
  0x1d   : > { %p731_p13 = pnand %p730_p12, %p883_p4  ;;  %p738_p3 = por %p737_p2, %p736_p1 }
  0x1e   : > { %668 = vmatpush3.bf16.msra.mxu1 %v667_v20 }
  0x1f   : > { %p732_p0 = pneg %p731_p13 }
  0x21   : > { %p739_p5 = pnand %p738_p3, %p732_p0 }
  0xee   : > { %v367_v22 = vpop.f32.mrb[0].mxu0 }
  0xef   : > { %v368_v23 = vadd.f32 %v599_v21, %v367_v22  ;;  %v631_v24 = vpop.f32.mrb[1].mxu0 }
  0xf1   : > { %v372_v25 = vmul.f32 0.70710677, %v368_v23  ;;  %v371_v27 = vmul.f32 0.5, %v368_v23 }
  0xf3   : > { %727 = verf.f32 %v372_v25 }
  0xfd   : > { %v728_v26 = vpop.eup %727 }
  0xfe   : > { %v374_v28 = vadd.f32 1.0, %v728_v26 }
 0x100   : > { %v375_v29 = vmul.f32 %v374_v28, %v371_v27 }
 0x102   : > { %649 = vmatmul.mubr.msk.f32.vlgmr.msra.gmra.mrb[0].mxu1 %vm391_vm2, %v375_v29 }
 0x1d5   : > { %v461_v31 = vpop.f32.mrb[0].mxu1 }
 0x1d6   : > { %v462_v32 = vadd.f32 %v601_v30, %v461_v31  ;;  %v650_v33 = vpop.f32.mrb[1].mxu1 }
 0x1d8   : > { %465 = vst.msk [vmem:[%s267_s13] sm:$0xff] %vm297_vm1, %v462_v32 }
 0x1d9   : > { %742 = shalt.err (!%p739_p5)
}
 0x1da   : > { %s743_s7 = scalar_lea.hbm %s951_s17, 128  ;;  %s747_s10 = scalar_lea.hbm %s1004_s5, 256 }
 0x1db   : > { %p744_p6 = scmp.ne.s32.totalorder %s951_s17, %s743_s7  ;;  %p748_p10 = scmp.lt.u32.totalorder %s951_s17, %s1004_s5 }
 0x1dc   : > { %p749_p11 = scmp.lt.u32.totalorder %s747_s10, %s743_s7  ;;  %p751_p13 = scmp.lt.u32.totalorder %s743_s7, %s951_s17 }
 0x1dd   : > { %p745_p7 = pnand %p744_p6, %p883_p4 }
 0x1de   : > { %p750_p12 = por %p749_p11, %p748_p10 }
 0x1df   : > { %p746_p9 = pneg %p745_p7 }
 0x1e0   : > { %p752_p0 = por %p751_p13, %p750_p12 }
 0x1e2   : > { %p753_p1 = pnand %p752_p0, %p746_p9 }
 0x1e4   : > { %756 = shalt.err (!%p753_p1)
}
 0x1e5   : > { %669 = dma.vmem_to_hbm [thread:$0]  (%p883_p4), %s953_s14, 128, %s951_s17, %s467_s24  }
 0x1e6 PF: > { %p675_p2 = scmp.ge.s32.totalorder %s807_s23, 2  ;;  %s492_s13 = sand.u32 1, %s787_s18  }
 0x1e7   : > { %s493_s15 = scalar_lea.sflag [#allocation3], %s492_s13 }
 0x1e8   : > { %p672_p3 = pnand %p675_p2, %p890_p8 }
 0x1ea   : > { %782 = dma.done.wait (!%p672_p3), %s493_s15, 128  }
 0x1eb   : > { %784 = vsyncadd (!%p672_p3), %s493_s15, 4294967168  ;;  %s18_s23 = sadd.s32 1, %s807_s23   ;;  %s1007_s18 = smov %s791_s19 }
 0x1ec   : > { %p15_p5 = scmp.ge.s32.totalorder %s18_s23, 4   ;;  %s1008_s19 = smov %s795_s20 }
 0x1ed   : > { %s1009_s20 = smov %s896_s6  ;;  %s1010_s21 = smov %s803_s22 }
 0x1ee   : > { %s1011_s22 = smov %s1013_s26  ;;  %17 = sbr.rel (!%p15_p5) target bundleno = 4 (0x4), region = 84 }
 0x1f5   :  { %498 = vsyncpa [#allocation3], 1 }
 0x1f6   :  { %500 = vsyncpa [#allocation3 + $0x1], 1 }

</bundles_post_ra>
